<compile_context>
chip_gen: v5e
topology: v5e:2x2
jax: 0.10.0
libtpu: 0.0.40
codegen_flags: <defaults>
</compile_context>

<pallas_src>
import jax
import jax.numpy as jnp
from jax.experimental import pallas as pl
from jax.experimental.pallas import tpu as pltpu


def _round_up(x, m):
    return ((x + m - 1) // m) * m


def _cdiv(a, b):
    return (a + b - 1) // b


def make_critic_kernel(n_actions):
    """Kernel factory, specialized on the size of the value head."""

    def kernel(x_ref, w1_ref, w2_ref, b2_ref, out_ref):
        # Layer 1: h = relu(x @ W1).  b1 is already folded into W1 (row K),
        # matched by the 1.0 column the wrapper appends to x, so there is no
        # separate bias add and no b1 input block.
        h = jnp.dot(x_ref[...], w1_ref[...], preferred_element_type=jnp.float32)
        h = jnp.maximum(h, 0.0)

        if n_actions == 1:
            # Value head, N == 1: produce the output transposed as [1, TB] so
            # the store is lane-dense (unmasked vst, 4 B/row writeback) instead
            # of a lane-width-1 masked vst.msk.  w2t is [1, Hp]; contracting
            # both operands on their last dim (the flash-attention q @ k^T
            # dimension numbers) yields [1, TB] directly with no extra
            # transpose of h.
            v = jax.lax.dot_general(
                w2_ref[...], h, (((1,), (1,)), ((), ())),
                preferred_element_type=jnp.float32)            # [1, TB]
        else:
            # General N > 1: W2 stored MXU-canonically as [Hp, Np] (Np a
            # multiple of 128) -> plain matmul, lane-dense [TB, Np] output.
            v = jnp.dot(h, w2_ref[...], preferred_element_type=jnp.float32)

        out_ref[...] = (v + b2_ref[...]).astype(out_ref.dtype)

    return kernel


def init_params(key, n_states, n_actions, hidden=100):
    """Deterministic synthetic params, torch-Linear-like uniform init.

    Returns torch-equivalent (pre-transposed to [in, out]) params:
      w1: [K, H], b1: [H], w2: [H, N], b2: [N]   with K = n_states + n_actions
    """
    k1, k2, k3, k4 = jax.random.split(key, 4)
    fan_in1 = n_states + n_actions
    bound1 = 1.0 / jnp.sqrt(fan_in1)
    w1 = jax.random.uniform(k1, (fan_in1, hidden), jnp.float32, -bound1, bound1)
    b1 = jax.random.uniform(k2, (hidden,), jnp.float32, -bound1, bound1)
    bound2 = 1.0 / jnp.sqrt(hidden)
    w2 = jax.random.uniform(k3, (hidden, n_actions), jnp.float32, -bound2, bound2)
    b2 = jax.random.uniform(k4, (n_actions,), jnp.float32, -bound2, bound2)
    return w1, b1, w2, b2


def pack_params(params, compute_dtype=jnp.float32):
    """Pad / transpose torch-like params into the lane-dense kernel layout.

    w1p : [Kp, Hp]  Kp = round_up(K + 1, 8), Hp = round_up(H, 128).
                    rows 0..K-1 = W1, row K = b1 (bias fold), rest zero.
                    Stored in `compute_dtype` (f32 or bf16) for the MXU.
    N == 1: w2 : [1, Hp]  = W2^T, zero-padded lanes (f32)
            b2 : [1, 1]
    N  > 1: w2 : [Hp, Np] with Np = round_up(N, 128), zero pads (f32)
            b2 : [1, Np]
    Zero-padded rows/lanes contribute exactly 0 (ReLU(0) = 0), padded batch
    rows are sliced off in the wrapper.
    """
    w1, b1, w2, b2 = params
    K, H = w1.shape
    N = w2.shape[1]
    Kp = _round_up(K + 1, 8)
    Hp = _round_up(H, 128)

    w1p = jnp.zeros((Kp, Hp), jnp.float32)
    w1p = w1p.at[:K, :H].set(w1)
    w1p = w1p.at[K, :H].set(b1)        # bias row; x carries a matching 1.0 column
    w1p = w1p.astype(compute_dtype)

    if N == 1:
        w2p = jnp.zeros((1, Hp), jnp.float32).at[:, :H].set(w2.T)
        b2p = b2.reshape(1, 1).astype(jnp.float32)
    else:
        Np = _round_up(N, 128)
        w2p = jnp.zeros((Hp, Np), jnp.float32).at[:H, :N].set(w2)
        b2p = jnp.zeros((1, Np), jnp.float32).at[0, :N].set(b2)

    return {"w1": w1p, "w2": w2p, "b2": b2p, "n_actions": N, "n_features": K}


def critic_forward(s, a, packed, *, block_b=4096, min_split_rows=1024):
    """s: [B, n_states], a: [B, n_actions] -> state value [B, n_actions].

    block_b        : max batch-tile rows.  Per-step VMEM ~ TB*512 B for the f32
                     h intermediate plus double-buffered x/out tiles; 4096 rows
                     (~2.5 MiB) fits all of v5e/v6e (128 MiB) and v7x (64 MiB
                     physical / 32 MiB default scoped) with large headroom.
    min_split_rows : once the 8-padded batch reaches this size, force >= 2 grid
                     steps so both of v7x's TensorCores get work.
    """
    w1p, w2p, b2p = packed["w1"], packed["w2"], packed["b2"]
    N = packed["n_actions"]
    cdt = w1p.dtype
    B = s.shape[0]
    K = s.shape[1] + a.shape[1]
    Kp, Hp = w1p.shape
    assert K == packed["n_features"]

    # x = [s | a | 1 | 0-pad]: the 1.0 column multiplies the folded b1 row of
    # w1p; the zero pad columns hit zero rows of w1p.
    # TODO(synk): at very large batch, pass s/a as separate inputs and assemble
    # this tile in a VMEM scratch inside the kernel to skip one HBM round-trip.
    x = jnp.concatenate(
        [s.astype(cdt), a.astype(cdt), jnp.ones((B, 1), cdt)], axis=1)

    # Batch tiling: pad to the sublane quantum (8) first, then pick a tile
    # count and a tile size dividing the padded batch -> waste < 128*nt rows.
    B8 = _round_up(B, 8)
    nt = max(1, _cdiv(B8, block_b))
    if nt == 1 and B8 >= min_split_rows:
        nt = 2                                  # keep both v7x TensorCores busy
    if nt == 1:
        TB = B8                                 # single tile = full padded batch
    else:
        TB = _round_up(_cdiv(B8, nt), 128)      # 128-aligned => lane-dense tiles
    Bp = nt * TB

    x = jnp.pad(x, ((0, Bp - B), (0, Kp - (K + 1))))

    kernel = make_critic_kernel(N)
    # NOTE: on v7x, pltpu.CORE_PARALLEL on this axis is worth benchmarking;
    # plain PARALLEL is kept for portability across v5e/v6e/v7x.
    cparams = pltpu.CompilerParams(dimension_semantics=(pltpu.PARALLEL,))

    if N == 1:
        out = pl.pallas_call(
            kernel,
            out_shape=jax.ShapeDtypeStruct((1, Bp), jnp.float32),
            grid=(nt,),
            in_specs=[
                pl.BlockSpec((TB, Kp), lambda i: (i, 0)),  # x : tiled over batch
                pl.BlockSpec((Kp, Hp), lambda i: (0, 0)),  # W1 (+b1 row): resident
                pl.BlockSpec((1, Hp), lambda i: (0, 0)),   # W2^T
                pl.BlockSpec((1, 1), lambda i: (0, 0)),    # b2
            ],
            out_specs=pl.BlockSpec((1, TB), lambda i: (0, i)),  # lane-dense row
            compiler_params=cparams,
        )(x, w1p, w2p, b2p)
        return out.T[:B]                                   # [B, 1]
    else:
        Np = w2p.shape[1]
        out = pl.pallas_call(
            kernel,
            out_shape=jax.ShapeDtypeStruct((Bp, Np), jnp.float32),
            grid=(nt,),
            in_specs=[
                pl.BlockSpec((TB, Kp), lambda i: (i, 0)),
                pl.BlockSpec((Kp, Hp), lambda i: (0, 0)),
                pl.BlockSpec((Hp, Np), lambda i: (0, 0)),  # W2 canonical [Hp, Np]
                pl.BlockSpec((1, Np), lambda i: (0, 0)),
            ],
            out_specs=pl.BlockSpec((TB, Np), lambda i: (i, 0)),  # Np = k*128
            compiler_params=cparams,
        )(x, w1p, w2p, b2p)
        return out[:B, :N]


def reference_forward(s, a, params):
    """Pure-JAX reference with exact PyTorch semantics (concat->fc->relu->v_head)."""
    w1, b1, w2, b2 = params
    x = jnp.concatenate([s, a], axis=1)
    h = jnp.maximum(x @ w1 + b1[None, :], 0.0)
    return h @ w2 + b2[None, :]


if __name__ == "__main__":
    def run_case(case_id, n_states, n_actions, batch, compute_dtype, atol, rtol,
                 block_b=4096):
        k = jax.random.fold_in(jax.random.PRNGKey(0), case_id)
        kp, ks, ka = jax.random.split(k, 3)
        params = init_params(kp, n_states, n_actions)
        packed = pack_params(params, compute_dtype=compute_dtype)
        s = jax.random.normal(ks, (batch, n_states), jnp.float32)
        a = jax.random.normal(ka, (batch, n_actions), jnp.float32)
        out = jax.block_until_ready(critic_forward(s, a, packed, block_b=block_b))
        ref = reference_forward(s, a, params)
        assert out.shape == (batch, n_actions), (out.shape, (batch, n_actions))
        err = jnp.max(jnp.abs(out - ref))
        assert jnp.allclose(out, ref, atol=atol, rtol=rtol), \
            f"Pallas kernel mismatch vs reference (case {case_id}, max err {err})"

    # 1) Pendulum sizes (n_states=3, n_actions=1, hidden=100), f32, single tile.
    run_case(0, n_states=3, n_actions=1, batch=8,
             compute_dtype=jnp.float32, atol=1e-4, rtol=1e-4)
    # 2) Multi-action value head: exercises the N>1 lane-dense [Hp, Np] path,
    #    odd batch exercises the 8-row batch padding + output slicing.
    run_case(1, n_states=5, n_actions=3, batch=37,
             compute_dtype=jnp.float32, atol=1e-4, rtol=1e-4)
    # 3) Multi-tile grid (3 steps, 128-aligned tiles), f32, tight tolerance.
    run_case(2, n_states=3, n_actions=1, batch=300,
             compute_dtype=jnp.float32, atol=1e-4, rtol=1e-4, block_b=128)
    # 4) bf16 activations/W1 (MXU-rate / half-HBM path), loose bf16 tolerance.
    run_case(3, n_states=3, n_actions=1, batch=300,
             compute_dtype=jnp.bfloat16, atol=1e-1, rtol=5e-2, block_b=128)

    print("KERNEL_OK")
</pallas_src>

<mosaic_0001>
module attributes {stable_mosaic.version = 11 : i64} {
  func.func @kernel(%arg0: i32, %arg1: memref<8x8xf32, #tpu.memory_space<vmem>>, %arg2: memref<8x128xf32, #tpu.memory_space<vmem>>, %arg3: memref<1x128xf32, #tpu.memory_space<vmem>>, %arg4: memref<1x1xf32, #tpu.memory_space<vmem>>, %arg5: memref<1x8xf32, #tpu.memory_space<vmem>>) attributes {dimension_semantics = [#tpu.dimension_semantics<parallel>], iteration_bounds = array<i64: 1>, scalar_prefetch = 0 : i64, scratch_operands = 0 : i64, tpu.core_type = #tpu.core_type<tc>, window_params = [{transform_indices = @transform_0, window_bounds = array<i64: 8, 8>}, {pipeline_mode = #tpu.pipeline_mode<synchronous>, transform_indices = @transform_1, window_bounds = array<i64: 8, 128>}, {pipeline_mode = #tpu.pipeline_mode<synchronous>, transform_indices = @transform_2, window_bounds = array<i64: 1, 128>}, {pipeline_mode = #tpu.pipeline_mode<synchronous>, transform_indices = @transform_3, window_bounds = array<i64: 1, 1>}, {transform_indices = @transform_4, window_bounds = array<i64: 1, 8>}]} {
    %c0 = arith.constant 0 : index
    %c0_0 = arith.constant 0 : index
    %0 = vector.load %arg1[%c0, %c0_0] : memref<8x8xf32, #tpu.memory_space<vmem>>, vector<8x8xf32>
    %c0_1 = arith.constant 0 : index
    %c0_2 = arith.constant 0 : index
    %1 = vector.load %arg2[%c0_1, %c0_2] : memref<8x128xf32, #tpu.memory_space<vmem>>, vector<8x128xf32>
    %cst = arith.constant dense<0.000000e+00> : vector<8x128xf32>
    %2 = tpu.matmul %0, %1, %cst {dimension_numbers = #tpu.dot_dimension_numbers<[1], [0], [0], [1], [0, 0, 1, 1], [], []>} : vector<8x8xf32>, vector<8x128xf32>, vector<8x128xf32> -> vector<8x128xf32>
    %cst_3 = arith.constant 0.000000e+00 : f32
    %3 = vector.broadcast %cst_3 : f32 to vector<8x128xf32>
    %4 = arith.maximumf %2, %3 : vector<8x128xf32>
    %c0_4 = arith.constant 0 : index
    %c0_5 = arith.constant 0 : index
    %5 = vector.load %arg3[%c0_4, %c0_5] : memref<1x128xf32, #tpu.memory_space<vmem>>, vector<1x128xf32>
    %cst_6 = arith.constant dense<0.000000e+00> : vector<1x8xf32>
    %6 = tpu.matmul %5, %4, %cst_6 {dimension_numbers = #tpu.dot_dimension_numbers<[1], [1], [0], [0], [0, 0, 1, 0], [], []>} : vector<1x128xf32>, vector<8x128xf32>, vector<1x8xf32> -> vector<1x8xf32>
    %c0_7 = arith.constant 0 : index
    %c0_8 = arith.constant 0 : index
    %7 = vector.load %arg4[%c0_7, %c0_8] : memref<1x1xf32, #tpu.memory_space<vmem>>, vector<1x1xf32>
    %8 = vector.broadcast %7 : vector<1x1xf32> to vector<1x8xf32>
    %9 = arith.addf %6, %8 : vector<1x8xf32>
    %c0_9 = arith.constant 0 : index
    %c0_10 = arith.constant 0 : index
    %10 = vector.load %arg5[%c0_9, %c0_10] : memref<1x8xf32, #tpu.memory_space<vmem>>, vector<1x8xf32>
    tpu.vector_store %arg5[%c0_9, %c0_10], %9 {strides = array<i32>} : memref<1x8xf32, #tpu.memory_space<vmem>>, vector<1x8xf32>,
    return
  }
  func.func @transform_0(%arg0: i32) -> (i32, i32) {
    %c0_i32 = arith.constant 0 : i32
    %c0_i32_0 = arith.constant 0 : i32
    return %arg0, %c0_i32 : i32, i32
  }
  func.func @transform_1(%arg0: i32) -> (i32, i32) {
    %c0_i32 = arith.constant 0 : i32
    %c0_i32_0 = arith.constant 0 : i32
    %c0_i32_1 = arith.constant 0 : i32
    return %c0_i32, %c0_i32_0 : i32, i32
  }
  func.func @transform_2(%arg0: i32) -> (i32, i32) {
    %c0_i32 = arith.constant 0 : i32
    %c0_i32_0 = arith.constant 0 : i32
    %c0_i32_1 = arith.constant 0 : i32
    return %c0_i32, %c0_i32_0 : i32, i32
  }
  func.func @transform_3(%arg0: i32) -> (i32, i32) {
    %c0_i32 = arith.constant 0 : i32
    %c0_i32_0 = arith.constant 0 : i32
    %c0_i32_1 = arith.constant 0 : i32
    return %c0_i32, %c0_i32_0 : i32, i32
  }
  func.func @transform_4(%arg0: i32) -> (i32, i32) {
    %c0_i32 = arith.constant 0 : i32
    %c0_i32_0 = arith.constant 0 : i32
    return %c0_i32, %arg0 : i32, i32
  }
}

</mosaic_0001>

<bundles_post_ra>
// kernel: tpu_custom_call.1
= control target key start
LH: loop header
LB: loop body
LE: loop exit
PB: predicated region body
PF: predicated region fallthrough
CT: control target
= control target key end

     0   :  { %s251_s0 = inlined_call_operand.hbm [shape: f32[8,8], index: 0, kind: input, shape index: {}]   ;;  %s252_s1 = inlined_call_operand.hbm [shape: f32[8,128], index: 1, kind: input, shape index: {}]   ;;  %s253_s2 = inlined_call_operand.vmem [shape: f32[1,128], index: 2, kind: input, shape index: {}]   ;;  %s254_s3 = inlined_call_operand.<no memory space> [shape: f32[1,1], index: 3, kind: input, shape index: {}]   ;;  %s255_s4 = inlined_call_operand.hbm [shape: f32[1,8], index: 4, kind: output, shape index: {}]  }
   0x1   :  { %v9_v0 = vstv %s254_s3 }
   0x2   :  { %10 = vst [vmem:[#allocation2] sm:$0x1] %v9_v0 }
   0x3   :  { %11 = vsyncpa [#allocation4], 0 }
   0x4   :  { %12 = vsyncpa [#allocation7], 0 }
   0x5   :  { %13 = vsyncpa [#allocation5], 0  ;;  %s19_s19 = sshll.u32 %s251_s0, 4  ;;  %s207_s20 = smov [#allocation3]   ;;  %s20_s19 = int_to_ptr.hbm [resolvable:$true] %s19_s19 }
   0x6   :  { %s21_s21 = sshll.u32 %s207_s20, 4  ;;  %s30_s24 = sshll.u32 %s252_s1, 4  ;;  %s22_s21 = int_to_ptr.vmem [resolvable:$true] %s21_s21  ;;  %s31_s24 = int_to_ptr.hbm [resolvable:$true] %s30_s24 }
   0x7   :  { %24 = dma.hbm_to_vmem [thread:$0]  %s20_s19, 128, %s22_s21, [#allocation4]  }
   0x8   :  { %s208_s25 = smov [#allocation6]  }
   0x9   :  { %s32_s3 = sshll.u32 %s208_s25, 4  ;;  %s33_s3 = int_to_ptr.vmem [resolvable:$true] %s32_s3 }
   0xa   :  { %35 = dma.hbm_to_vmem [thread:$0]  %s31_s24, 128, %s33_s3, [#allocation7]  }
   0xb   :  { %201 = dma.done.wait [#allocation4], 128  }
   0xc   :  { %202 = vsyncadd [#allocation4], 4294967168 }
   0xd   :  { %203 = dma.done.wait [#allocation7], 128  }
   0xe   :  { %204 = vsyncadd [#allocation7], 4294967168  ;;  %vm50_vm0 = vcmask 64512   ;;  %v49_v1 = vld [vmem:[#allocation6] sm:$0xff]  ;;  %v48_v2 = vld [vmem:[#allocation3] sm:$0xff]  ;;  %v209_v4 = vmov 0  }
   0xf   :  { %69 = vmatpush.msra.mxu0 %v49_v1  ;;  %v76_v3 = vld [vmem:[#allocation2] sm:$0x1]  ;;  %128 = vset.pattern.permute.xlu0 %v209_v4  ;;  %s210_s26 = smov [#allocation8]   ;;  %s112_s30 = sshll.u32 %s255_s4, 4  ;;  %vm103_vm1 = vcmask 57344   ;;  %s113_s30 = int_to_ptr.hbm [resolvable:$true] %s112_s30 }
  0x10   :  { %123 = vmatmul.msk.f32.vlgmr.msra.gmra.mxu0 %vm50_vm0, %v48_v2  ;;  %79 = vperm.xlu0 %128, %v76_v3   ;;  %v75_v7 = vld [vmem:[%s253_s2] sm:$0x1]  ;;  %s110_s27 = sshll.u32 %s210_s26, 4  ;;  %s111_s27 = int_to_ptr.vmem [resolvable:$true] %s110_s27 }
  0x82   :  { %v80_v8 = vpop.permute.xlu0 %79 }
  0x83   :  { %v82_v9 = vperm.slane %v80_v8, 0 }
  0x8d   :  { %v71_v5 = vpop.f32.mrf.mxu0 }
  0x8e   :  { %v74_v6 = vmax.f32 %v71_v5, 0.0 }
  0x90   :  { %98 = vmatpush.xpose.msra.mxu1 %v74_v6 }
  0x93   :  { %99 = vmatmul.f32.vlgmr.msra.gmra.mxu1 %v75_v7 }
 0x110   :  { %v100_v10 = vpop.f32.mrf.mxu1 }
 0x111   :  { %v101_v11 = vadd.f32 %v100_v10, %v82_v9 }
 0x113   :  { %104 = vst.msk [vmem:[#allocation8] sm:$0x1] %vm103_vm1, %v101_v11 }
 0x114   :  { %115 = dma.vmem_to_hbm [thread:$0]  %s111_s27, 16, %s113_s30, [#allocation5]  }
 0x115   :  { %205 = dma.done.wait [#allocation5], 16  }
 0x116   :  { %206 = vsyncadd [#allocation5], 4294967280 }
 0x117   :  { %120 = vsyncpa [#allocation4], 1 }
 0x118   :  { %121 = vsyncpa [#allocation7], 1 }
 0x119   :  { %122 = vsyncpa [#allocation5], 1 }

</bundles_post_ra>
